<compile_context>
chip_gen: v5e
topology: v5e:2x2
jax: 0.10.0
libtpu: 0.0.40
codegen_flags: <defaults>
</compile_context>

<pallas_src>
from functools import partial

import jax
import jax.numpy as jnp
from jax.experimental import pallas as pl
from jax.experimental.pallas import tpu as pltpu


# ----------------------------------------------------------------------------
# Fused kernel: weight-net (1x1 conv + folded BN + ReLU + 1x1 conv) +
#               involution aggregation + pointwise 1x1 conv, per spatial tile.
# ----------------------------------------------------------------------------
def _involution_fused_kernel(K, tile_h, W, p,
                             x_ref, w1_ref, b1_ref, w2e_ref, b2e_ref, wp_ref,
                             o_ref):
    # x_ref   : (1, 1, tile_h+2p, W+2p, C)  halo'd, zero-padded input tile (NHWC)
    # w1_ref  : (C, Cmid)        conv1 weight with BN scale folded in
    # b1_ref  : (1, Cmid)        folded BN bias
    # w2e_ref : (K*K, Cmid, C)   conv2 weight, per-tap column-selected AND
    #                            group->channel expanded (w2e[k,m,c] = w2[m, (c//16)*K*K + k])
    # b2e_ref : (K*K, 1, C)      conv2 bias, same expansion
    # wp_ref  : (C, Cout)        pointwise 1x1 conv weight (no bias)
    # o_ref   : (1, 1, tile_h, W, Cout)
    C = x_ref.shape[-1]
    Cout = o_ref.shape[-1]
    N = tile_h * W

    x_tile = x_ref[0, 0]                                   # (tile_h+2p, W+2p, C)

    # K W-shifted slabs (the only sublane-misaligned slices), reused across row shifts.
    xsw = [x_tile[:, kj:kj + W, :] for kj in range(K)]     # each (tile_h+2p, W, C)

    # ---- fused per-pixel weight branch: conv1 (BN folded) + ReLU ----
    xc = xsw[p][p:p + tile_h, :, :].reshape(N, C)          # center pixels of the tile
    h = jnp.dot(xc, w1_ref[...], preferred_element_type=jnp.float32) + b1_ref[...]
    h = jnp.maximum(h, 0.0).astype(w2e_ref.dtype)          # (N, Cmid)

    # ---- involution MAC over the K*K window, fp32 accumulation ----
    acc = jnp.zeros((N, C), jnp.float32)
    for k in range(K * K):                                 # static unrolled window loop
        ki, kj = divmod(k, K)
        # conv2 column + group->channel broadcast folded into one small MXU matmul
        wk = jnp.dot(h, w2e_ref[k], preferred_element_type=jnp.float32) + b2e_ref[k]
        xs = xsw[kj][ki:ki + tile_h, :, :].reshape(N, C).astype(jnp.float32)
        acc = acc + wk * xs

    # ---- pointwise 1x1 conv (no bias) ----
    out = jnp.dot(acc, wp_ref[...].astype(jnp.float32),
                  preferred_element_type=jnp.float32)       # (N, Cout)
    o_ref[0, 0] = out.reshape(tile_h, W, Cout).astype(o_ref.dtype)


# ----------------------------------------------------------------------------
# Wrapper: layout glue (NCHW<->NHWC), BN folding, weight re-packing, halo tiling.
# ----------------------------------------------------------------------------
def involution_forward(x_nchw, params, kernel_size=3, stride=1,
                       tile_h=4, compute_dtype=jnp.float32):
    assert stride == 1, "only stride=1 implemented"
    # TODO(synk): stride>1 branch (AvgPool2d on weight branch + strided Unfold) not implemented.
    B, C, H, W = x_nchw.shape
    K = kernel_size
    p = (K - 1) // 2
    group_channels = 16
    eps = 1e-5
    assert C % group_channels == 0
    assert H % tile_h == 0, "tile_h must divide H"
    nH = H // tile_h
    Cmid = params["w1"].shape[1]
    Cout = params["wp"].shape[1]

    x = jnp.transpose(x_nchw, (0, 2, 3, 1)).astype(jnp.float32)   # NCHW -> NHWC

    # Fold BN (eval mode) into conv1:  w1' = w1 * scale,  b1 = beta - mean * scale
    scale = params["gamma"] / jnp.sqrt(params["var"] + eps)
    w1f = (params["w1"] * scale[None, :]).astype(compute_dtype)          # (C, Cmid)
    b1 = (params["beta"] - params["mean"] * scale).reshape(1, Cmid)      # (1, Cmid) fp32

    # Fold the per-tap column selection AND the group->channel broadcast into conv2:
    #   w2e[k, m, c] = w2[m, (c//16)*K*K + k],   b2e[k, c] = b2[(c//16)*K*K + k]
    col = (jnp.arange(C) // group_channels)[None, :] * (K * K) \
        + jnp.arange(K * K)[:, None]                                     # (K*K, C)
    w2e = jnp.transpose(params["w2"][:, col], (1, 0, 2)).astype(compute_dtype)  # (K*K, Cmid, C)
    b2e = params["b2"][col].reshape(K * K, 1, C).astype(jnp.float32)            # (K*K, 1, C)

    wp = params["wp"].astype(compute_dtype)                                     # (C, Cout)

    # Zero-pad spatially and build overlapping (halo'd) row tiles:
    #   x_tiles[b, t] = x_pad[b, t*tile_h : t*tile_h + tile_h + 2p]
    # TODO(synk): replace this pad+tile HBM pass with in-kernel halo DMA (memory_space=pl.ANY).
    x_pad = jnp.pad(x, ((0, 0), (p, p), (p, p), (0, 0)))
    rows = jnp.arange(nH)[:, None] * tile_h + jnp.arange(tile_h + 2 * p)[None, :]
    x_tiles = jnp.take(x_pad, rows, axis=1).astype(compute_dtype)   # (B, nH, tile_h+2p, W+2p, C)

    Th = tile_h + 2 * p
    Wp = W + 2 * p

    out = pl.pallas_call(
        partial(_involution_fused_kernel, K, tile_h, W, p),
        grid=(B, nH),
        in_specs=[
            pl.BlockSpec((1, 1, Th, Wp, C), lambda b, t: (b, t, 0, 0, 0)),
            pl.BlockSpec((C, Cmid), lambda b, t: (0, 0)),
            pl.BlockSpec((1, Cmid), lambda b, t: (0, 0)),
            pl.BlockSpec((K * K, Cmid, C), lambda b, t: (0, 0, 0)),
            pl.BlockSpec((K * K, 1, C), lambda b, t: (0, 0, 0)),
            pl.BlockSpec((C, Cout), lambda b, t: (0, 0)),
        ],
        out_specs=pl.BlockSpec((1, 1, tile_h, W, Cout), lambda b, t: (b, t, 0, 0, 0)),
        out_shape=jax.ShapeDtypeStruct((B, nH, tile_h, W, Cout), jnp.float32),
        compiler_params=pltpu.CompilerParams(
            dimension_semantics=("parallel", "parallel"),
            vmem_limit_bytes=32 * 1024 * 1024),
    )(x_tiles, w1f, b1, w2e, b2e, wp)

    out = out.reshape(B, H, W, Cout)
    return jnp.transpose(out, (0, 3, 1, 2))   # NHWC -> NCHW


# ----------------------------------------------------------------------------
# Pure-JAX reference (mirrors the PyTorch forward) for correctness check
# ----------------------------------------------------------------------------
def involution_ref(x_nchw, params, kernel_size=3):
    B, C, H, W = x_nchw.shape
    K = kernel_size
    p = (K - 1) // 2
    groups = C // 16
    eps = 1e-5

    x_flat = jnp.transpose(x_nchw, (0, 2, 3, 1)).reshape(-1, C)
    h = x_flat @ params["w1"]
    scale = params["gamma"] / jnp.sqrt(params["var"] + eps)
    bias = params["beta"] - params["mean"] * scale
    h = jnp.maximum(h * scale + bias, 0.0)
    wmap = (h @ params["w2"] + params["b2"]).reshape(B, H, W, groups, K * K)

    xp = jnp.pad(x_nchw, ((0, 0), (0, 0), (p, p), (p, p)))
    acc = jnp.zeros((B, C, H, W), jnp.float32)
    for k in range(K * K):
        ki, kj = k // K, k % K
        wk = jnp.repeat(wmap[..., k], 16, axis=-1)            # (B,H,W,C)
        wk = jnp.transpose(wk, (0, 3, 1, 2))                  # (B,C,H,W)
        acc = acc + wk * xp[:, :, ki:ki + H, kj:kj + W]
    return jnp.einsum("bchw,cd->bdhw", acc, params["wp"])


if __name__ == "__main__":
    # module config: involution(channels=32, out=32, kernel_size=3, stride=1)
    C, Cout, K, stride = 32, 32, 3, 1
    Cmid = C // 4            # reduction_ratio = 4
    groups = C // 16         # group_channels = 16
    B, H, W = 2, 16, 16

    key = jax.random.PRNGKey(0)
    kx, k0, k1, k2, k3, k4, k5, k6, k7 = jax.random.split(key, 9)

    params = {
        "w1": jax.random.normal(k0, (C, Cmid), jnp.float32) * 0.1,        # conv1 1x1 (no bias)
        "gamma": 1.0 + 0.1 * jax.random.normal(k1, (Cmid,), jnp.float32), # BN weight
        "beta": 0.1 * jax.random.normal(k2, (Cmid,), jnp.float32),        # BN bias
        "mean": 0.1 * jax.random.normal(k3, (Cmid,), jnp.float32),        # BN running_mean
        "var": jax.random.uniform(k4, (Cmid,), jnp.float32, 0.5, 1.5),    # BN running_var
        "w2": jax.random.normal(k5, (Cmid, groups * K * K), jnp.float32) * 0.1,  # conv2 1x1
        "b2": jax.random.normal(k6, (groups * K * K,), jnp.float32) * 0.1,       # conv2 bias
        "wp": jax.random.normal(k7, (C, Cout), jnp.float32) * 0.1,        # pointwise (no bias)
    }

    x = jax.random.normal(kx, (B, C, H, W), jnp.float32)   # NCHW input, PyTorch convention

    ref = involution_ref(x, params, kernel_size=K)

    # fp32 path: strict check against the reference.
    out = involution_forward(x, params, kernel_size=K, stride=stride, tile_h=4,
                             compute_dtype=jnp.float32)
    out = jax.block_until_ready(out)
    err = float(jnp.max(jnp.abs(out - ref)))
    assert out.shape == (B, Cout, H, W)
    assert err < 1e-3, f"fp32 mismatch vs reference, max abs err = {err}"

    # bf16-storage path (v6e/v7x recommendation): halves HBM/VMEM traffic for the
    # memory-bound aggregation; fp32 accumulation retained, so only bf16 input/weight
    # rounding remains -> loose tolerance.
    out_bf16 = involution_forward(x, params, kernel_size=K, stride=stride, tile_h=4,
                                  compute_dtype=jnp.bfloat16)
    out_bf16 = jax.block_until_ready(out_bf16)
    err_bf16 = float(jnp.max(jnp.abs(out_bf16 - ref)))
    assert err_bf16 < 1e-1, f"bf16 mismatch vs reference, max abs err = {err_bf16}"

    print("KERNEL_OK")
</pallas_src>

<mosaic_0001>
module attributes {stable_mosaic.version = 11 : i64} {
  func.func @_involution_fused_kernel(%arg0: i32, %arg1: i32, %arg2: memref<1x1x6x18x32xf32, #tpu.memory_space<vmem>>, %arg3: memref<32x8xf32, #tpu.memory_space<vmem>>, %arg4: memref<1x8xf32, #tpu.memory_space<vmem>>, %arg5: memref<9x8x32xf32, #tpu.memory_space<vmem>>, %arg6: memref<9x1x32xf32, #tpu.memory_space<vmem>>, %arg7: memref<32x32xf32, #tpu.memory_space<vmem>>, %arg8: memref<1x1x4x16x32xf32, #tpu.memory_space<vmem>>) attributes {dimension_semantics = [#tpu.dimension_semantics<parallel>, #tpu.dimension_semantics<parallel>], iteration_bounds = array<i64: 2, 4>, scalar_prefetch = 0 : i64, scratch_operands = 0 : i64, tpu.core_type = #tpu.core_type<tc>, window_params = [{transform_indices = @transform_0, window_bounds = array<i64: 1, 1, 6, 18, 32>}, {pipeline_mode = #tpu.pipeline_mode<synchronous>, transform_indices = @transform_1, window_bounds = array<i64: 32, 8>}, {pipeline_mode = #tpu.pipeline_mode<synchronous>, transform_indices = @transform_2, window_bounds = array<i64: 1, 8>}, {pipeline_mode = #tpu.pipeline_mode<synchronous>, transform_indices = @transform_3, window_bounds = array<i64: 9, 8, 32>}, {pipeline_mode = #tpu.pipeline_mode<synchronous>, transform_indices = @transform_4, window_bounds = array<i64: 9, 1, 32>}, {pipeline_mode = #tpu.pipeline_mode<synchronous>, transform_indices = @transform_5, window_bounds = array<i64: 32, 32>}, {transform_indices = @transform_6, window_bounds = array<i64: 1, 1, 4, 16, 32>}]} {
    %c0 = arith.constant 0 : index
    %c0_0 = arith.constant 0 : index
    %c0_1 = arith.constant 0 : index
    %c0_2 = arith.constant 0 : index
    %c0_3 = arith.constant 0 : index
    %0 = vector.load %arg2[%c0, %c0_0, %c0_1, %c0_2, %c0_3] : memref<1x1x6x18x32xf32, #tpu.memory_space<vmem>>, vector<1x1x6x18x32xf32>
    %1 = vector.shape_cast %0 : vector<1x1x6x18x32xf32> to vector<6x18x32xf32>
    %2 = vector.extract_strided_slice %1 {offsets = [0, 0, 0], sizes = [6, 16, 32], strides = [1, 1, 1]} : vector<6x18x32xf32> to vector<6x16x32xf32>
    %3 = vector.extract_strided_slice %1 {offsets = [0, 1, 0], sizes = [6, 16, 32], strides = [1, 1, 1]} : vector<6x18x32xf32> to vector<6x16x32xf32>
    %4 = vector.extract_strided_slice %1 {offsets = [0, 2, 0], sizes = [6, 16, 32], strides = [1, 1, 1]} : vector<6x18x32xf32> to vector<6x16x32xf32>
    %5 = vector.extract_strided_slice %3 {offsets = [1, 0, 0], sizes = [4, 16, 32], strides = [1, 1, 1]} : vector<6x16x32xf32> to vector<4x16x32xf32>
    %6 = vector.shape_cast %5 : vector<4x16x32xf32> to vector<64x32xf32>
    %c0_4 = arith.constant 0 : index
    %c0_5 = arith.constant 0 : index
    %7 = vector.load %arg3[%c0_4, %c0_5] : memref<32x8xf32, #tpu.memory_space<vmem>>, vector<32x8xf32>
    %cst = arith.constant dense<0.000000e+00> : vector<64x8xf32>
    %8 = tpu.matmul %6, %7, %cst {dimension_numbers = #tpu.dot_dimension_numbers<[1], [0], [0], [1], [0, 0, 1, 1], [], []>} : vector<64x32xf32>, vector<32x8xf32>, vector<64x8xf32> -> vector<64x8xf32>
    %c0_6 = arith.constant 0 : index
    %c0_7 = arith.constant 0 : index
    %9 = vector.load %arg4[%c0_6, %c0_7] : memref<1x8xf32, #tpu.memory_space<vmem>>, vector<1x8xf32>
    %10 = vector.broadcast %9 : vector<1x8xf32> to vector<64x8xf32>
    %11 = arith.addf %8, %10 : vector<64x8xf32>
    %cst_8 = arith.constant 0.000000e+00 : f32
    %12 = vector.broadcast %cst_8 : f32 to vector<64x8xf32>
    %13 = arith.maximumf %11, %12 : vector<64x8xf32>
    %cst_9 = arith.constant 0.000000e+00 : f32
    %14 = vector.broadcast %cst_9 : f32 to vector<64x32xf32>
    %c0_10 = arith.constant 0 : index
    %c0_11 = arith.constant 0 : index
    %c0_12 = arith.constant 0 : index
    %15 = vector.load %arg5[%c0_10, %c0_11, %c0_12] : memref<9x8x32xf32, #tpu.memory_space<vmem>>, vector<1x8x32xf32>
    %16 = vector.shape_cast %15 : vector<1x8x32xf32> to vector<8x32xf32>
    %cst_13 = arith.constant dense<0.000000e+00> : vector<64x32xf32>
    %17 = tpu.matmul %13, %16, %cst_13 {dimension_numbers = #tpu.dot_dimension_numbers<[1], [0], [0], [1], [0, 0, 1, 1], [], []>} : vector<64x8xf32>, vector<8x32xf32>, vector<64x32xf32> -> vector<64x32xf32>
    %c0_14 = arith.constant 0 : index
    %c0_15 = arith.constant 0 : index
    %c0_16 = arith.constant 0 : index
    %18 = vector.load %arg6[%c0_14, %c0_15, %c0_16] : memref<9x1x32xf32, #tpu.memory_space<vmem>>, vector<1x1x32xf32>
    %19 = vector.shape_cast %18 : vector<1x1x32xf32> to vector<1x32xf32>
    %20 = vector.broadcast %19 : vector<1x32xf32> to vector<64x32xf32>
    %21 = arith.addf %17, %20 : vector<64x32xf32>
    %22 = vector.extract_strided_slice %2 {offsets = [0, 0, 0], sizes = [4, 16, 32], strides = [1, 1, 1]} : vector<6x16x32xf32> to vector<4x16x32xf32>
    %23 = vector.shape_cast %22 : vector<4x16x32xf32> to vector<64x32xf32>
    %24 = arith.mulf %21, %23 : vector<64x32xf32>
    %25 = arith.addf %14, %24 : vector<64x32xf32>
    %c1 = arith.constant 1 : index
    %c0_17 = arith.constant 0 : index
    %c0_18 = arith.constant 0 : index
    %26 = vector.load %arg5[%c1, %c0_17, %c0_18] : memref<9x8x32xf32, #tpu.memory_space<vmem>>, vector<1x8x32xf32>
    %27 = vector.shape_cast %26 : vector<1x8x32xf32> to vector<8x32xf32>
    %cst_19 = arith.constant dense<0.000000e+00> : vector<64x32xf32>
    %28 = tpu.matmul %13, %27, %cst_19 {dimension_numbers = #tpu.dot_dimension_numbers<[1], [0], [0], [1], [0, 0, 1, 1], [], []>} : vector<64x8xf32>, vector<8x32xf32>, vector<64x32xf32> -> vector<64x32xf32>
    %c1_20 = arith.constant 1 : index
    %c0_21 = arith.constant 0 : index
    %c0_22 = arith.constant 0 : index
    %29 = vector.load %arg6[%c1_20, %c0_21, %c0_22] : memref<9x1x32xf32, #tpu.memory_space<vmem>>, vector<1x1x32xf32>
    %30 = vector.shape_cast %29 : vector<1x1x32xf32> to vector<1x32xf32>
    %31 = vector.broadcast %30 : vector<1x32xf32> to vector<64x32xf32>
    %32 = arith.addf %28, %31 : vector<64x32xf32>
    %33 = vector.extract_strided_slice %3 {offsets = [0, 0, 0], sizes = [4, 16, 32], strides = [1, 1, 1]} : vector<6x16x32xf32> to vector<4x16x32xf32>
    %34 = vector.shape_cast %33 : vector<4x16x32xf32> to vector<64x32xf32>
    %35 = arith.mulf %32, %34 : vector<64x32xf32>
    %36 = arith.addf %25, %35 : vector<64x32xf32>
    %c2 = arith.constant 2 : index
    %c0_23 = arith.constant 0 : index
    %c0_24 = arith.constant 0 : index
    %37 = vector.load %arg5[%c2, %c0_23, %c0_24] : memref<9x8x32xf32, #tpu.memory_space<vmem>>, vector<1x8x32xf32>
    %38 = vector.shape_cast %37 : vector<1x8x32xf32> to vector<8x32xf32>
    %cst_25 = arith.constant dense<0.000000e+00> : vector<64x32xf32>
    %39 = tpu.matmul %13, %38, %cst_25 {dimension_numbers = #tpu.dot_dimension_numbers<[1], [0], [0], [1], [0, 0, 1, 1], [], []>} : vector<64x8xf32>, vector<8x32xf32>, vector<64x32xf32> -> vector<64x32xf32>
    %c2_26 = arith.constant 2 : index
    %c0_27 = arith.constant 0 : index
    %c0_28 = arith.constant 0 : index
    %40 = vector.load %arg6[%c2_26, %c0_27, %c0_28] : memref<9x1x32xf32, #tpu.memory_space<vmem>>, vector<1x1x32xf32>
    %41 = vector.shape_cast %40 : vector<1x1x32xf32> to vector<1x32xf32>
    %42 = vector.broadcast %41 : vector<1x32xf32> to vector<64x32xf32>
    %43 = arith.addf %39, %42 : vector<64x32xf32>
    %44 = vector.extract_strided_slice %4 {offsets = [0, 0, 0], sizes = [4, 16, 32], strides = [1, 1, 1]} : vector<6x16x32xf32> to vector<4x16x32xf32>
    %45 = vector.shape_cast %44 : vector<4x16x32xf32> to vector<64x32xf32>
    %46 = arith.mulf %43, %45 : vector<64x32xf32>
    %47 = arith.addf %36, %46 : vector<64x32xf32>
    %c3 = arith.constant 3 : index
    %c0_29 = arith.constant 0 : index
    %c0_30 = arith.constant 0 : index
    %48 = vector.load %arg5[%c3, %c0_29, %c0_30] : memref<9x8x32xf32, #tpu.memory_space<vmem>>, vector<1x8x32xf32>
    %49 = vector.shape_cast %48 : vector<1x8x32xf32> to vector<8x32xf32>
    %cst_31 = arith.constant dense<0.000000e+00> : vector<64x32xf32>
    %50 = tpu.matmul %13, %49, %cst_31 {dimension_numbers = #tpu.dot_dimension_numbers<[1], [0], [0], [1], [0, 0, 1, 1], [], []>} : vector<64x8xf32>, vector<8x32xf32>, vector<64x32xf32> -> vector<64x32xf32>
    %c3_32 = arith.constant 3 : index
    %c0_33 = arith.constant 0 : index
    %c0_34 = arith.constant 0 : index
    %51 = vector.load %arg6[%c3_32, %c0_33, %c0_34] : memref<9x1x32xf32, #tpu.memory_space<vmem>>, vector<1x1x32xf32>
    %52 = vector.shape_cast %51 : vector<1x1x32xf32> to vector<1x32xf32>
    %53 = vector.broadcast %52 : vector<1x32xf32> to vector<64x32xf32>
    %54 = arith.addf %50, %53 : vector<64x32xf32>
    %55 = vector.extract_strided_slice %2 {offsets = [1, 0, 0], sizes = [4, 16, 32], strides = [1, 1, 1]} : vector<6x16x32xf32> to vector<4x16x32xf32>
    %56 = vector.shape_cast %55 : vector<4x16x32xf32> to vector<64x32xf32>
    %57 = arith.mulf %54, %56 : vector<64x32xf32>
    %58 = arith.addf %47, %57 : vector<64x32xf32>
    %c4 = arith.constant 4 : index
    %c0_35 = arith.constant 0 : index
    %c0_36 = arith.constant 0 : index
    %59 = vector.load %arg5[%c4, %c0_35, %c0_36] : memref<9x8x32xf32, #tpu.memory_space<vmem>>, vector<1x8x32xf32>
    %60 = vector.shape_cast %59 : vector<1x8x32xf32> to vector<8x32xf32>
    %cst_37 = arith.constant dense<0.000000e+00> : vector<64x32xf32>
    %61 = tpu.matmul %13, %60, %cst_37 {dimension_numbers = #tpu.dot_dimension_numbers<[1], [0], [0], [1], [0, 0, 1, 1], [], []>} : vector<64x8xf32>, vector<8x32xf32>, vector<64x32xf32> -> vector<64x32xf32>
    %c4_38 = arith.constant 4 : index
    %c0_39 = arith.constant 0 : index
    %c0_40 = arith.constant 0 : index
    %62 = vector.load %arg6[%c4_38, %c0_39, %c0_40] : memref<9x1x32xf32, #tpu.memory_space<vmem>>, vector<1x1x32xf32>
    %63 = vector.shape_cast %62 : vector<1x1x32xf32> to vector<1x32xf32>
    %64 = vector.broadcast %63 : vector<1x32xf32> to vector<64x32xf32>
    %65 = arith.addf %61, %64 : vector<64x32xf32>
    %66 = vector.extract_strided_slice %3 {offsets = [1, 0, 0], sizes = [4, 16, 32], strides = [1, 1, 1]} : vector<6x16x32xf32> to vector<4x16x32xf32>
    %67 = vector.shape_cast %66 : vector<4x16x32xf32> to vector<64x32xf32>
    %68 = arith.mulf %65, %67 : vector<64x32xf32>
    %69 = arith.addf %58, %68 : vector<64x32xf32>
    %c5 = arith.constant 5 : index
    %c0_41 = arith.constant 0 : index
    %c0_42 = arith.constant 0 : index
    %70 = vector.load %arg5[%c5, %c0_41, %c0_42] : memref<9x8x32xf32, #tpu.memory_space<vmem>>, vector<1x8x32xf32>
    %71 = vector.shape_cast %70 : vector<1x8x32xf32> to vector<8x32xf32>
    %cst_43 = arith.constant dense<0.000000e+00> : vector<64x32xf32>
    %72 = tpu.matmul %13, %71, %cst_43 {dimension_numbers = #tpu.dot_dimension_numbers<[1], [0], [0], [1], [0, 0, 1, 1], [], []>} : vector<64x8xf32>, vector<8x32xf32>, vector<64x32xf32> -> vector<64x32xf32>
    %c5_44 = arith.constant 5 : index
    %c0_45 = arith.constant 0 : index
    %c0_46 = arith.constant 0 : index
    %73 = vector.load %arg6[%c5_44, %c0_45, %c0_46] : memref<9x1x32xf32, #tpu.memory_space<vmem>>, vector<1x1x32xf32>
    %74 = vector.shape_cast %73 : vector<1x1x32xf32> to vector<1x32xf32>
    %75 = vector.broadcast %74 : vector<1x32xf32> to vector<64x32xf32>
    %76 = arith.addf %72, %75 : vector<64x32xf32>
    %77 = vector.extract_strided_slice %4 {offsets = [1, 0, 0], sizes = [4, 16, 32], strides = [1, 1, 1]} : vector<6x16x32xf32> to vector<4x16x32xf32>
    %78 = vector.shape_cast %77 : vector<4x16x32xf32> to vector<64x32xf32>
    %79 = arith.mulf %76, %78 : vector<64x32xf32>
    %80 = arith.addf %69, %79 : vector<64x32xf32>
    %c6 = arith.constant 6 : index
    %c0_47 = arith.constant 0 : index
    %c0_48 = arith.constant 0 : index
    %81 = vector.load %arg5[%c6, %c0_47, %c0_48] : memref<9x8x32xf32, #tpu.memory_space<vmem>>, vector<1x8x32xf32>
    %82 = vector.shape_cast %81 : vector<1x8x32xf32> to vector<8x32xf32>
    %cst_49 = arith.constant dense<0.000000e+00> : vector<64x32xf32>
    %83 = tpu.matmul %13, %82, %cst_49 {dimension_numbers = #tpu.dot_dimension_numbers<[1], [0], [0], [1], [0, 0, 1, 1], [], []>} : vector<64x8xf32>, vector<8x32xf32>, vector<64x32xf32> -> vector<64x32xf32>
    %c6_50 = arith.constant 6 : index
    %c0_51 = arith.constant 0 : index
    %c0_52 = arith.constant 0 : index
    %84 = vector.load %arg6[%c6_50, %c0_51, %c0_52] : memref<9x1x32xf32, #tpu.memory_space<vmem>>, vector<1x1x32xf32>
    %85 = vector.shape_cast %84 : vector<1x1x32xf32> to vector<1x32xf32>
    %86 = vector.broadcast %85 : vector<1x32xf32> to vector<64x32xf32>
    %87 = arith.addf %83, %86 : vector<64x32xf32>
    %88 = vector.extract_strided_slice %2 {offsets = [2, 0, 0], sizes = [4, 16, 32], strides = [1, 1, 1]} : vector<6x16x32xf32> to vector<4x16x32xf32>
    %89 = vector.shape_cast %88 : vector<4x16x32xf32> to vector<64x32xf32>
    %90 = arith.mulf %87, %89 : vector<64x32xf32>
    %91 = arith.addf %80, %90 : vector<64x32xf32>
    %c7 = arith.constant 7 : index
    %c0_53 = arith.constant 0 : index
    %c0_54 = arith.constant 0 : index
    %92 = vector.load %arg5[%c7, %c0_53, %c0_54] : memref<9x8x32xf32, #tpu.memory_space<vmem>>, vector<1x8x32xf32>
    %93 = vector.shape_cast %92 : vector<1x8x32xf32> to vector<8x32xf32>
    %cst_55 = arith.constant dense<0.000000e+00> : vector<64x32xf32>
    %94 = tpu.matmul %13, %93, %cst_55 {dimension_numbers = #tpu.dot_dimension_numbers<[1], [0], [0], [1], [0, 0, 1, 1], [], []>} : vector<64x8xf32>, vector<8x32xf32>, vector<64x32xf32> -> vector<64x32xf32>
    %c7_56 = arith.constant 7 : index
    %c0_57 = arith.constant 0 : index
    %c0_58 = arith.constant 0 : index
    %95 = vector.load %arg6[%c7_56, %c0_57, %c0_58] : memref<9x1x32xf32, #tpu.memory_space<vmem>>, vector<1x1x32xf32>
    %96 = vector.shape_cast %95 : vector<1x1x32xf32> to vector<1x32xf32>
    %97 = vector.broadcast %96 : vector<1x32xf32> to vector<64x32xf32>
    %98 = arith.addf %94, %97 : vector<64x32xf32>
    %99 = vector.extract_strided_slice %3 {offsets = [2, 0, 0], sizes = [4, 16, 32], strides = [1, 1, 1]} : vector<6x16x32xf32> to vector<4x16x32xf32>
    %100 = vector.shape_cast %99 : vector<4x16x32xf32> to vector<64x32xf32>
    %101 = arith.mulf %98, %100 : vector<64x32xf32>
    %102 = arith.addf %91, %101 : vector<64x32xf32>
    %c8 = arith.constant 8 : index
    %c0_59 = arith.constant 0 : index
    %c0_60 = arith.constant 0 : index
    %103 = vector.load %arg5[%c8, %c0_59, %c0_60] : memref<9x8x32xf32, #tpu.memory_space<vmem>>, vector<1x8x32xf32>
    %104 = vector.shape_cast %103 : vector<1x8x32xf32> to vector<8x32xf32>
    %cst_61 = arith.constant dense<0.000000e+00> : vector<64x32xf32>
    %105 = tpu.matmul %13, %104, %cst_61 {dimension_numbers = #tpu.dot_dimension_numbers<[1], [0], [0], [1], [0, 0, 1, 1], [], []>} : vector<64x8xf32>, vector<8x32xf32>, vector<64x32xf32> -> vector<64x32xf32>
    %c8_62 = arith.constant 8 : index
    %c0_63 = arith.constant 0 : index
    %c0_64 = arith.constant 0 : index
    %106 = vector.load %arg6[%c8_62, %c0_63, %c0_64] : memref<9x1x32xf32, #tpu.memory_space<vmem>>, vector<1x1x32xf32>
    %107 = vector.shape_cast %106 : vector<1x1x32xf32> to vector<1x32xf32>
    %108 = vector.broadcast %107 : vector<1x32xf32> to vector<64x32xf32>
    %109 = arith.addf %105, %108 : vector<64x32xf32>
    %110 = vector.extract_strided_slice %4 {offsets = [2, 0, 0], sizes = [4, 16, 32], strides = [1, 1, 1]} : vector<6x16x32xf32> to vector<4x16x32xf32>
    %111 = vector.shape_cast %110 : vector<4x16x32xf32> to vector<64x32xf32>
    %112 = arith.mulf %109, %111 : vector<64x32xf32>
    %113 = arith.addf %102, %112 : vector<64x32xf32>
    %c0_65 = arith.constant 0 : index
    %c0_66 = arith.constant 0 : index
    %114 = vector.load %arg7[%c0_65, %c0_66] : memref<32x32xf32, #tpu.memory_space<vmem>>, vector<32x32xf32>
    %cst_67 = arith.constant dense<0.000000e+00> : vector<64x32xf32>
    %115 = tpu.matmul %113, %114, %cst_67 {dimension_numbers = #tpu.dot_dimension_numbers<[1], [0], [0], [1], [0, 0, 1, 1], [], []>} : vector<64x32xf32>, vector<32x32xf32>, vector<64x32xf32> -> vector<64x32xf32>
    %116 = vector.shape_cast %115 : vector<64x32xf32> to vector<4x16x32xf32>
    %c0_68 = arith.constant 0 : index
    %c0_69 = arith.constant 0 : index
    %c0_70 = arith.constant 0 : index
    %c0_71 = arith.constant 0 : index
    %c0_72 = arith.constant 0 : index
    %117 = vector.load %arg8[%c0_68, %c0_69, %c0_70, %c0_71, %c0_72] : memref<1x1x4x16x32xf32, #tpu.memory_space<vmem>>, vector<1x1x4x16x32xf32>
    %118 = vector.shape_cast %117 : vector<1x1x4x16x32xf32> to vector<4x16x32xf32>
    %119 = vector.shape_cast %116 : vector<4x16x32xf32> to vector<1x1x4x16x32xf32>
    tpu.vector_store %arg8[%c0_68, %c0_69, %c0_70, %c0_71, %c0_72], %119 {strides = array<i32>} : memref<1x1x4x16x32xf32, #tpu.memory_space<vmem>>, vector<1x1x4x16x32xf32>,
    return
  }
  func.func @transform_0(%arg0: i32, %arg1: i32) -> (i32, i32, i32, i32, i32) {
    %c0_i32 = arith.constant 0 : i32
    %c0_i32_0 = arith.constant 0 : i32
    %c0_i32_1 = arith.constant 0 : i32
    %c0_i32_2 = arith.constant 0 : i32
    return %arg0, %arg1, %c0_i32, %c0_i32_0, %c0_i32_1 : i32, i32, i32, i32, i32
  }
  func.func @transform_1(%arg0: i32, %arg1: i32) -> (i32, i32) {
    %c0_i32 = arith.constant 0 : i32
    %c0_i32_0 = arith.constant 0 : i32
    %c0_i32_1 = arith.constant 0 : i32
    return %c0_i32, %c0_i32_0 : i32, i32
  }
  func.func @transform_2(%arg0: i32, %arg1: i32) -> (i32, i32) {
    %c0_i32 = arith.constant 0 : i32
    %c0_i32_0 = arith.constant 0 : i32
    %c0_i32_1 = arith.constant 0 : i32
    return %c0_i32, %c0_i32_0 : i32, i32
  }
  func.func @transform_3(%arg0: i32, %arg1: i32) -> (i32, i32, i32) {
    %c0_i32 = arith.constant 0 : i32
    %c0_i32_0 = arith.constant 0 : i32
    %c0_i32_1 = arith.constant 0 : i32
    %c0_i32_2 = arith.constant 0 : i32
    return %c0_i32, %c0_i32_0, %c0_i32_1 : i32, i32, i32
  }
  func.func @transform_4(%arg0: i32, %arg1: i32) -> (i32, i32, i32) {
    %c0_i32 = arith.constant 0 : i32
    %c0_i32_0 = arith.constant 0 : i32
    %c0_i32_1 = arith.constant 0 : i32
    %c0_i32_2 = arith.constant 0 : i32
    return %c0_i32, %c0_i32_0, %c0_i32_1 : i32, i32, i32
  }
  func.func @transform_5(%arg0: i32, %arg1: i32) -> (i32, i32) {
    %c0_i32 = arith.constant 0 : i32
    %c0_i32_0 = arith.constant 0 : i32
    %c0_i32_1 = arith.constant 0 : i32
    return %c0_i32, %c0_i32_0 : i32, i32
  }
  func.func @transform_6(%arg0: i32, %arg1: i32) -> (i32, i32, i32, i32, i32) {
    %c0_i32 = arith.constant 0 : i32
    %c0_i32_0 = arith.constant 0 : i32
    %c0_i32_1 = arith.constant 0 : i32
    %c0_i32_2 = arith.constant 0 : i32
    return %arg0, %arg1, %c0_i32, %c0_i32_0, %c0_i32_1 : i32, i32, i32, i32, i32
  }
}

</mosaic_0001>

<bundles_post_ra>
// kernel: tpu_custom_call.1
= control target key start
LH: loop header
LB: loop body
LE: loop exit
PB: predicated region body
PF: predicated region fallthrough
CT: control target
= control target key end

     0   :  { %11 = vsyncpa [#allocation3], 0  ;;  %s2315_s0 = inlined_call_operand.vmem [shape: f32[2,4,6,18,32], index: 0, kind: input, shape index: {}]   ;;  %s2316_s1 = inlined_call_operand.vmem [shape: f32[32,8], index: 1, kind: input, shape index: {}]   ;;  %s2317_s2 = inlined_call_operand.vmem [shape: f32[1,8], index: 2, kind: input, shape index: {}]   ;;  %s2318_s3 = inlined_call_operand.vmem [shape: f32[9,8,32], index: 3, kind: input, shape index: {}]   ;;  %s2319_s4 = inlined_call_operand.vmem [shape: f32[9,1,32], index: 4, kind: input, shape index: {}]   ;;  %s2320_s5 = inlined_call_operand.vmem [shape: f32[32,32], index: 5, kind: input, shape index: {}]   ;;  %s2321_s6 = inlined_call_operand.hbm [shape: f32[2,4,4,16,32], index: 6, kind: output, shape index: {}]  }
   0x1   :  { %13 = vsyncpa [#allocation3 + $0x1], 0  ;;  %s1591_s21 = smov 0   ;;  %s1593_s22 = smov 0  }
   0x2   :  { %s1595_s23 = smov 0   ;;  %s1597_s24 = smov 0  }
   0x3   :  { %s1599_s25 = smov 0   ;;  %s1601_s26 = smov 0  }
   0x4   :  { %s1603_s27 = smov 0   ;;  %s1605_s28 = smov 0  }
   0x5 LB: > { %s1253_s29 = sadd.s32 4294967295, %s1552_s28   ;;  %s1254_s30 = sadd.s32 4294967294, %s1552_s28   ;;  %s1552_s28 = sphi %s1605_s28, %s19_s28   ;;  %s1548_s27 = sphi %s1603_s27, %s2365_s27   ;;  %s1544_s26 = sphi %s1601_s26, %s2364_s26   ;;  %s1540_s25 = sphi %s1599_s25, %s2363_s25   ;;  %s1536_s24 = sphi %s1597_s24, %s2362_s24   ;;  %s1532_s23 = sphi %s1595_s23, %s2361_s23   ;;  %s1528_s22 = sphi %s1593_s22, %s2360_s22   ;;  %s1524_s21 = sphi %s1591_s21, %s2359_s21  }
   0x6   : > { %s28_s7 = sadd.s32 1, %s1544_s26  ;;  %s31_s8 = sadd.s32 1, %s1548_s27 }
   0x7   : > { %p29_p0 = scmp.ge.s32.totalorder %s28_s7, 4  ;;  %p183_p1 = scmp.ne.s32.totalorder %s1532_s23, %s1528_s22 }
   0x8   : > { %p184_p2 = scmp.eq.s32.totalorder %s1253_s29, 7  ;;  %p189_p5 = scmp.ne.s32.totalorder %s1528_s22, %s1524_s21 }
   0x9   : > { %s2367_s7 = smov (%p29_p0, %s28_s7), 0  ;;  %s2369_s8 = smov (!%p29_p0, %s31_s8), %s1548_s27 }
   0xa   : > { %2333 = sst [smem:[#allocation5_spill]] %s2367_s7  ;;  %s169_s9 = ssub.s32 %s1544_s26, %s2367_s7 }
   0xb   : > { %p1642_p3 = por %p184_p2, %p183_p1  ;;  %p33_p4 = scmp.ge.s32.totalorder %s2369_s8, 2 }
   0xc   : > { %p190_p6 = scmp.eq.s32.totalorder %s1254_s30, 7  ;;  %p1257_p7 = scmp.ge.s32.totalorder %s1552_s28, 1 }
   0xd   : > { %s2371_s8 = smov (%p33_p4, %s2369_s8), 0  ;;  %p235_p9 = scmp.lt.s32.totalorder %s1552_s28, 9 }
   0xe   : > { %2335 = sst [smem:[#allocation6_spill]] %s2371_s8  ;;  %p1651_p8 = por %p190_p6, %p189_p5 }
   0xf   : > { %s168_s12 = ssub.s32 %s1548_s27, %s2371_s8  ;;  %s173_s13 = sadd.s32 1, %s1532_s23 }
  0x10   : > { %s170_s14 = sor.u32 %s169_s9, %s168_s12  ;;  %p236_p10 = pnand %p1257_p7, %p235_p9 }
  0x11   : > { %p171_p11 = scmp.eq.s32.totalorder %s170_s14, 0 }
  0x12   : > { %239 = sbr.rel (%p236_p10) target bundleno = 626 (0x272), region = 44 }
  0x13   : > { %s1660_s15 = scalar_select %p171_p11, %s1532_s23, %s173_s13  }
  0x17   : > { %v340_v0 = vld [vmem:[%s2316_s1 + $0x18] sm:$0xff]  ;;  %v339_v1 = vld [vmem:[%s2316_s1 + $0x10] sm:$0xff]  ;;  %p269_p12 = scmp.lt.s32.totalorder %s1540_s25, 1  ;;  %p271_p13 = scmp.lt.s32.totalorder %s1536_s24, 3  ;;  %v338_v2 = vld [vmem:[%s2316_s1 + $0x8] sm:$0xff]  ;;  %vm308_vm0 = vcmask 1046528  }
  0x18   : > { %374 = vmatpush.msra.mxu0 %v340_v0  ;;  %v337_v3 = vld [vmem:[%s2316_s1] sm:$0xff]  ;;  %vm345_vm1 = vcmask 261120   ;;  %v1276_v37 = vld [vmem:[%s2318_s3 + $0x8] sm:$0xff]  ;;  %v1286_v38 = vld [vmem:[%s2318_s3 + $0x10] sm:$0xff]  ;;  %vm416_vm2 = vcmask 64512   ;;  %vm620_vm3 = vcmask 1045504  }
  0x19   : > { %s270_s30 = scalar_select %p269_p12, %s1540_s25, 1  ;;  %v411_v36 = vld [vmem:[%s2318_s3] sm:$0xff]  ;;  %1371 = vmatpush.msra.mxu2 %v1276_v37  ;;  %1372 = vmatpush.msra.mxu3 %v1286_v38  ;;  %v1296_v40 = vld [vmem:[%s2318_s3 + $0x18] sm:$0xff]  ;;  %v1326_v48 = vld [vmem:[%s2318_s3 + $0x30] sm:$0xff] }
  0x1a   : > { %375 = vmatpush.msra.mxu0 %v339_v1  ;;  %s272_s9 = scalar_select %p271_p13, %s1536_s24, 3  ;;  %1370 = vmatpush.msra.mxu1 %v411_v36  ;;  %v1306_v39 = vld [vmem:[%s2318_s3 + $0x20] sm:$0xff]  ;;  %v1316_v55 = vld [vmem:[%s2318_s3 + $0x28] sm:$0xff]  ;;  %v1336_v60 = vld [vmem:[%s2318_s3 + $0x38] sm:$0xff] }
  0x1b   : > { %s1374_s14 = smul.u32 72, %s270_s30  ;;  %751 = vmatpush.msrb.mxu2 %v1306_v39  ;;  %v1448_v41 = vld [vmem:[%s2317_s2] ss:$0 sm:$0xff]  ;;  %815 = vmatpush.msrb.mxu3 %v1316_v55  ;;  %s1365_s8 = sshll.u32 %s1536_s24, 3 }
  0x1c   : > { %376 = vmatpush.msra.mxu0 %v338_v2  ;;  %s1373_s16 = smul.u32 18, %s272_s9  ;;  %687 = vmatpush.msrb.mxu1 %v1296_v40  ;;  %v1346_v59 = vld [vmem:[%s2318_s3 + $0x40] sm:$0xff]  ;;  %s1366_s20 = sshll.u32 %s1540_s25, 5 }
  0x1d   : > { %s1162_s29 = sadd.s32 %s1366_s20, %s1365_s8  ;;  %s1478_s20 = scalar_lea.hbm %s2321_s6, 512 }
  0x1e   : > { %377 = vmatpush.msra.mxu0 %v337_v3  ;;  %s275_s17 = sadd.s32 %s1374_s14, %s1373_s16  ;;  %s1367_s30 = sshll.u32 %s1162_s29, 3 }
  0x1f   : > { %s1259_s18 = sshll.u32 %s275_s17, 3  ;;  %s1164_s13 = scalar_lea.hbm %s2321_s6, %s1367_s30 }
  0x20   : > { %s1681_s7 = scalar_lea.vmem %s2315_s0, %s1259_s18  ;;  %456 = vmatpush.msrb.mxu0 %v411_v36  ;;  %s1167_s16 = sshll.u32 %s1164_s13, 4  ;;  %s1168_s16 = int_to_ptr.hbm [resolvable:$true] %s1167_s16 }
  0x21   : > { %v1684_v4 = vld [vmem:[%s1681_s7 + $0x18] sm:$0xff]  ;;  %v1687_v5 = vld [vmem:[%s1681_s7 + $0x20] sm:$0xff]  ;;  %v1692_v8 = vld [vmem:[%s1681_s7 + $0x28] sm:$0x3]  ;;  %s1472_s25 = sshra.s32 %s1168_s16, 4  ;;  %s1473_s25 = int_to_ptr.hbm [resolvable:$true] %s1472_s25 }
  0x22   : > { %v309_v6 = vrot.slane %v1684_v4, 1  ;;  %v310_v7 = vrot.slane %v1687_v5, 1  ;;  %v312_v10 = vrot.slane %v1692_v8, 1  ;;  %v1704_v12 = vld [vmem:[%s1681_s7 + $0x30] sm:$0xff]  ;;  %v1707_v13 = vld [vmem:[%s1681_s7 + $0x38] sm:$0xff]  ;;  %v1726_v20 = vld [vmem:[%s1681_s7 + $0x48] sm:$0xff]  ;;  %p1479_p4 = scmp.lt.s32.totalorder %s1473_s25, %s2321_s6 }
  0x23   : > { %v314_v14 = vrot.slane %v1704_v12, 1  ;;  %v315_v15 = vrot.slane %v1707_v13, 1  ;;  %v1717_v17 = vld [vmem:[%s1681_s7 + $0x40] sm:$0x3]  ;;  %v1729_v21 = vld [vmem:[%s1681_s7 + $0x50] sm:$0xff]  ;;  %v319_v22 = vrot.slane %v1726_v20, 1 }
  0x24   : > { %v1695_v9 = vsel %vm308_vm0, %v309_v6, %v310_v7  ;;  %v1701_v11 = vsel %vm308_vm0, %v310_v7, %v312_v10  ;;  %v317_v18 = vrot.slane %v1717_v17, 1  ;;  %v320_v23 = vrot.slane %v1729_v21, 1  ;;  %v1739_v25 = vld [vmem:[%s1681_s7 + $0x58] sm:$0x3]  ;;  %v1748_v28 = vld [vmem:[%s1681_s7 + $0x60] sm:$0xff]  ;;  %v1751_v29 = vld [vmem:[%s1681_s7 + $0x68] sm:$0xff] }
  0x25   : > { %1260 = vmatmul.msk.f32.vlgmr.msra.gmra.mxu0 %vm345_vm1, %v1695_v9  ;;  %v1714_v16 = vsel %vm308_vm0, %v314_v14, %v315_v15  ;;  %v322_v26 = vrot.slane %v1739_v25, 1  ;;  %2337 = vst [vmem:[#allocation7_spill] sm:$0xff] %v1748_v28  ;;  %v324_v30 = vrot.slane %v1748_v28, 1  ;;  %v325_v31 = vrot.slane %v1751_v29, 1  ;;  %v1761_v33 = vld [vmem:[%s1681_s7 + $0x70] sm:$0x3] }
  0x26   : > { %v1723_v19 = vsel %vm308_vm0, %v315_v15, %v317_v18  ;;  %v1736_v24 = vsel %vm308_vm0, %v319_v22, %v320_v23  ;;  %2338 = vst [vmem:[#allocation8_spill] sm:$0xff] %v1751_v29  ;;  %v327_v34 = vrot.slane %v1761_v33, 1  ;;  %520 = vmatpush.msra.mxu0 %v1276_v37  ;;  %v1934_v14 = vld [vmem:[%s1681_s7 + $0x10] sm:$0x3]  ;;  %v1937_v15 = vld [vmem:[%s1681_s7 + $0x8] sm:$0xff]  ;;  %s1474_s17 = scalar_lea.hbm %s1473_s25, 64 }
  0x27   : > { %v1745_v27 = vsel %vm308_vm0, %v320_v23, %v322_v26  ;;  %v1758_v32 = vsel %vm308_vm0, %v324_v30, %v325_v31  ;;  %2340 = vst [vmem:[#allocation10_spill] sm:$0xff] %v1761_v33  ;;  %v552_v18 = vrot.slane %v1934_v14, 1  ;;  %v1945_v22 = vld [vmem:[%s2319_s4] ss:$0 sm:$0xff]  ;;  %v550_v23 = vrot.slane %v1937_v15, 1  ;;  %p1475_p0 = scmp.ne.s32.totalorder %s1473_s25, %s1474_s17  ;;  %p1480_p5 = scmp.lt.s32.totalorder %s1478_s20, %s1474_s17 }
  0x28   : > { %2339 = vst [vmem:[#allocation9_spill] sm:$0xff] %v1758_v32  ;;  %v1767_v35 = vsel %vm308_vm0, %v325_v31, %v327_v34  ;;  %v1954_v30 = vld [vmem:[%s2319_s4 + $0x1] ss:$0 sm:$0xff] }
  0x29   : > { %2341 = vst [vmem:[#allocation11_spill] sm:$0xff] %v1767_v35  ;;  %v553_v34 = vsel %vm308_vm0, %v550_v23, %v552_v18  ;;  %p1476_p1 = pnand %p1475_p0, %p1642_p3  ;;  %p1481_p6 = por %p1480_p5, %p1479_p4 }
  0x2b   : > { %p1477_p2 = pneg %p1476_p1 }
  0x2d   : > { %1261 = vmatmul.msk.f32.gmra.mxu0 %vm345_vm1, %v1701_v11  ;;  %p1482_p7 = pnand %p1481_p6, %p1477_p2 }
  0x35   : > { %1262 = vmatmul.msk.f32.gmra.mxu0 %vm345_vm1, %v1714_v16 }
  0x3d   : > { %1263 = vmatmul.msk.f32.gmra.mxu0 %vm345_vm1, %v1723_v19 }
  0x45   : > { %1264 = vmatmul.msk.f32.gmra.mxu0 %vm345_vm1, %v1736_v24 }
  0x4d   : > { %1265 = vmatmul.msk.f32.gmra.mxu0 %vm345_vm1, %v1745_v27 }
  0x55   : > { %1266 = vmatmul.msk.f32.gmra.mxu0 %vm345_vm1, %v1758_v32 }
  0x5d   : > { %1267 = vmatmul.msk.f32.gmra.mxu0 %vm345_vm1, %v1767_v35 }
  0xa2   : > { %v379_v42 = vpop.f32.mrf.mxu0 }
  0xa3   : > { %v380_v43 = vadd.f32 %v1448_v41, %v379_v42 }
  0xa5   : > { %v1789_v44 = vmax.f32 %v380_v43, 0.0 }
  0xa7   : > { %1268 = vmatmul.msk.f32.vlgmr.msrb.gmra.mxu0 %vm416_vm2, %v1789_v44 }
  0xa8   : > { %594 = vmatpush.msrb.mxu0 %v1286_v38 }
  0xaa   : > { %v382_v45 = vpop.f32.mrf.mxu0 }
  0xab   : > { %v383_v46 = vadd.f32 %v1448_v41, %v382_v45 }
  0xad   : > { %v1793_v47 = vmax.f32 %v383_v46, 0.0 }
  0xaf   : > { %1269 = vmatmul.msk.f32.vlgmr.msra.gmra.mxu1 %vm416_vm2, %v1793_v47  ;;  %1278 = vmatmul.msk.f32.vlgmr.msra.gmra.mxu0 %vm416_vm2, %v1789_v44 }
  0xb0   : > { %1279 = vmatmul.msk.f32.vlgmr.msra.gmra.mxu2 %vm416_vm2, %v1793_v47  ;;  %1289 = vmatmul.msk.f32.vlgmr.msra.gmra.mxu3 %vm416_vm2, %v1793_v47 }
  0xb1   : > { %886 = vmatpush.msra.mxu0 %v1326_v48  ;;  %1024 = vmatpush.msra.mxu2 %v1346_v59 }
  0xb2   : > { %v385_v49 = vpop.f32.mrf.mxu0  ;;  %950 = vmatpush.msra.mxu1 %v1336_v60 }
  0xb3   : > { %v386_v50 = vadd.f32 %v1448_v41, %v385_v49 }
  0xb5   : > { %v1806_v51 = vmax.f32 %v386_v50, 0.0 }
  0xb7   : > { %1270 = vmatmul.msk.f32.gmra.mxu1 %vm416_vm2, %v1806_v51  ;;  %1288 = vmatmul.msk.f32.vlgmr.msrb.gmra.mxu0 %vm416_vm2, %v1789_v44 }
  0xb8   : > { %1280 = vmatmul.msk.f32.gmra.mxu2 %vm416_vm2, %v1806_v51  ;;  %1290 = vmatmul.msk.f32.gmra.mxu3 %vm416_vm2, %v1806_v51 }
  0xba   : > { %v388_v52 = vpop.f32.mrf.mxu0 }
  0xbb   : > { %v389_v53 = vadd.f32 %v1448_v41, %v388_v52 }
  0xbd   : > { %v1816_v54 = vmax.f32 %v389_v53, 0.0 }
  0xbf   : > { %1271 = vmatmul.msk.f32.gmra.mxu1 %vm416_vm2, %v1816_v54  ;;  %1328 = vmatmul.msk.f32.vlgmr.msra.gmra.mxu0 %vm416_vm2, %v1789_v44 }
  0xc0   : > { %1281 = vmatmul.msk.f32.gmra.mxu2 %vm416_vm2, %v1816_v54  ;;  %1291 = vmatmul.msk.f32.gmra.mxu3 %vm416_vm2, %v1816_v54 }
  0xc2   : > { %v391_v56 = vpop.f32.mrf.mxu0 }
  0xc3   : > { %v392_v57 = vadd.f32 %v1448_v41, %v391_v56 }
  0xc5   : > { %v1829_v58 = vmax.f32 %v392_v57, 0.0 }
  0xc7   : > { %1272 = vmatmul.msk.f32.gmra.mxu1 %vm416_vm2, %v1829_v58  ;;  %1329 = vmatmul.msk.f32.gmra.mxu0 %vm416_vm2, %v1793_v47 }
  0xc8   : > { %1282 = vmatmul.msk.f32.gmra.mxu2 %vm416_vm2, %v1829_v58  ;;  %1292 = vmatmul.msk.f32.gmra.mxu3 %vm416_vm2, %v1829_v58 }
  0xca   : > { %v394_v61 = vpop.f32.mrf.mxu0 }
  0xcb   : > { %v395_v62 = vadd.f32 %v1448_v41, %v394_v61 }
  0xcd   : > { %v1845_v63 = vmax.f32 %v395_v62, 0.0 }
  0xcf   : > { %1273 = vmatmul.msk.f32.gmra.mxu1 %vm416_vm2, %v1845_v63  ;;  %1330 = vmatmul.msk.f32.gmra.mxu0 %vm416_vm2, %v1806_v51 }
  0xd0   : > { %1283 = vmatmul.msk.f32.gmra.mxu2 %vm416_vm2, %v1845_v63  ;;  %1293 = vmatmul.msk.f32.gmra.mxu3 %vm416_vm2, %v1845_v63 }
  0xd2   : > { %v397_v0 = vpop.f32.mrf.mxu0 }
  0xd3   : > { %v398_v1 = vadd.f32 %v1448_v41, %v397_v0 }
  0xd5   : > { %v1855_v2 = vmax.f32 %v398_v1, 0.0  ;;  %v1076_v1 = vld [vmem:[%s2320_s5 + $0x18] sm:$0xff] }
  0xd6   : > { %1113 = vmatpush.msra.mxu3 %v1076_v1 }
  0xd7   : > { %1274 = vmatmul.msk.f32.gmra.mxu1 %vm416_vm2, %v1855_v2  ;;  %1331 = vmatmul.msk.f32.gmra.mxu0 %vm416_vm2, %v1816_v54 }
  0xd8   : > { %1284 = vmatmul.msk.f32.gmra.mxu2 %vm416_vm2, %v1855_v2  ;;  %1294 = vmatmul.msk.f32.gmra.mxu3 %vm416_vm2, %v1855_v2 }
  0xda   : > { %v400_v3 = vpop.f32.mrf.mxu0 }
  0xdb   : > { %v401_v6 = vadd.f32 %v1448_v41, %v400_v3 }
  0xdd   : > { %v1865_v7 = vmax.f32 %v401_v6, 0.0 }
  0xdf   : > { %1275 = vmatmul.msk.f32.gmra.mxu1 %vm416_vm2, %v1865_v7  ;;  %1332 = vmatmul.msk.f32.gmra.mxu0 %vm416_vm2, %v1829_v58 }
  0xe0   : > { %1285 = vmatmul.msk.f32.gmra.mxu2 %vm416_vm2, %v1865_v7  ;;  %1295 = vmatmul.msk.f32.gmra.mxu3 %vm416_vm2, %v1865_v7 }
  0xe7   : > { %1298 = vmatmul.msk.f32.vlgmr.msrb.gmra.mxu1 %vm416_vm2, %v1789_v44  ;;  %1333 = vmatmul.msk.f32.gmra.mxu0 %vm416_vm2, %v1845_v63 }
  0xe8   : > { %1308 = vmatmul.msk.f32.vlgmr.msrb.gmra.mxu2 %vm416_vm2, %v1789_v44  ;;  %1318 = vmatmul.msk.f32.vlgmr.msrb.gmra.mxu3 %vm416_vm2, %v1789_v44 }
  0xef   : > { %1299 = vmatmul.msk.f32.gmra.mxu1 %vm416_vm2, %v1793_v47  ;;  %1334 = vmatmul.msk.f32.gmra.mxu0 %vm416_vm2, %v1855_v2 }
  0xf0   : > { %1309 = vmatmul.msk.f32.gmra.mxu2 %vm416_vm2, %v1793_v47  ;;  %1319 = vmatmul.msk.f32.gmra.mxu3 %vm416_vm2, %v1793_v47 }
  0xf7   : > { %1300 = vmatmul.msk.f32.gmra.mxu1 %vm416_vm2, %v1806_v51  ;;  %1335 = vmatmul.msk.f32.gmra.mxu0 %vm416_vm2, %v1865_v7 }
  0xf8   : > { %1310 = vmatmul.msk.f32.gmra.mxu2 %vm416_vm2, %v1806_v51  ;;  %1320 = vmatmul.msk.f32.gmra.mxu3 %vm416_vm2, %v1806_v51 }
  0xff   : > { %1301 = vmatmul.msk.f32.gmra.mxu1 %vm416_vm2, %v1816_v54 }
 0x100   : > { %1311 = vmatmul.msk.f32.gmra.mxu2 %vm416_vm2, %v1816_v54  ;;  %1321 = vmatmul.msk.f32.gmra.mxu3 %vm416_vm2, %v1816_v54 }
 0x107   : > { %1302 = vmatmul.msk.f32.gmra.mxu1 %vm416_vm2, %v1829_v58 }
 0x108   : > { %1312 = vmatmul.msk.f32.gmra.mxu2 %vm416_vm2, %v1829_v58  ;;  %1322 = vmatmul.msk.f32.gmra.mxu3 %vm416_vm2, %v1829_v58 }
 0x10f   : > { %1303 = vmatmul.msk.f32.gmra.mxu1 %vm416_vm2, %v1845_v63 }
 0x110   : > { %1313 = vmatmul.msk.f32.gmra.mxu2 %vm416_vm2, %v1845_v63  ;;  %1323 = vmatmul.msk.f32.gmra.mxu3 %vm416_vm2, %v1845_v63 }
 0x117   : > { %1304 = vmatmul.msk.f32.gmra.mxu1 %vm416_vm2, %v1855_v2 }
 0x118   : > { %1314 = vmatmul.msk.f32.gmra.mxu2 %vm416_vm2, %v1855_v2  ;;  %1324 = vmatmul.msk.f32.gmra.mxu3 %vm416_vm2, %v1855_v2 }
 0x11f   : > { %1305 = vmatmul.msk.f32.gmra.mxu1 %vm416_vm2, %v1865_v7 }
 0x120   : > { %1315 = vmatmul.msk.f32.gmra.mxu2 %vm416_vm2, %v1865_v7  ;;  %1325 = vmatmul.msk.f32.gmra.mxu3 %vm416_vm2, %v1865_v7 }
 0x127   : > { %1338 = vmatmul.msk.f32.vlgmr.msra.gmra.mxu1 %vm416_vm2, %v1789_v44 }
 0x128   : > { %1348 = vmatmul.msk.f32.vlgmr.msra.gmra.mxu2 %vm416_vm2, %v1789_v44 }
 0x12c   : > { %v461_v10 = vpop.f32.mrf.mxu1 }
 0x12d   : > { %v462_v26 = vadd.f32 %v1945_v22, %v461_v10 }
 0x12f   : > { %1339 = vmatmul.msk.f32.gmra.mxu1 %vm416_vm2, %v1793_v47  ;;  %v483_v38 = vmul.f32 %v462_v26, %v1937_v15 }
 0x130   : > { %1349 = vmatmul.msk.f32.gmra.mxu2 %vm416_vm2, %v1793_v47 }
 0x133   : > { %v525_v31 = vpop.f32.mrf.mxu2  ;;  %v1988_v56 = vpop.f32.mrf.mxu3 }
 0x134   : > { %v526_v36 = vadd.f32 %v1954_v30, %v525_v31  ;;  %v464_v37 = vpop.f32.mrf.mxu1 }
 0x135   : > { %v465_v41 = vadd.f32 %v1945_v22, %v464_v37 }
 0x136   : > { %v557_v39 = vmul.f32 %v553_v34, %v526_v36 }
 0x137   : > { %1340 = vmatmul.msk.f32.gmra.mxu1 %vm416_vm2, %v1806_v51  ;;  %v484_v45 = vmul.f32 %v465_v41, %v1684_v4 }
 0x138   : > { %v1963_v40 = vadd.f32 %v557_v39, %v483_v38  ;;  %1350 = vmatmul.msk.f32.gmra.mxu2 %vm416_vm2, %v1806_v51 }
 0x13b   : > { %v528_v42 = vpop.f32.mrf.mxu2  ;;  %v2004_v18 = vpop.f32.mrf.mxu3 }
 0x13c   : > { %v529_v43 = vadd.f32 %v1954_v30, %v528_v42  ;;  %v467_v44 = vpop.f32.mrf.mxu1 }
 0x13d   : > { %v468_v48 = vadd.f32 %v1945_v22, %v467_v44  ;;  %v1075_v44 = vld [vmem:[%s2320_s5 + $0x10] sm:$0xff] }
 0x13e   : > { %v558_v46 = vmul.f32 %v529_v43, %v1695_v9  ;;  %1114 = vmatpush.msra.mxu3 %v1075_v44 }
 0x13f   : > { %1341 = vmatmul.msk.f32.gmra.mxu1 %vm416_vm2, %v1816_v54  ;;  %v485_v52 = vmul.f32 %v468_v48, %v1687_v5 }
 0x140   : > { %v1973_v47 = vadd.f32 %v558_v46, %v484_v45  ;;  %1351 = vmatmul.msk.f32.gmra.mxu2 %vm416_vm2, %v1816_v54 }
 0x143   : > { %v531_v49 = vpop.f32.mrf.mxu2  ;;  %v2018_v42 = vpop.f32.mrf.mxu3 }
 0x144   : > { %v532_v50 = vadd.f32 %v1954_v30, %v531_v49  ;;  %v470_v51 = vpop.f32.mrf.mxu1 }
 0x145   : > { %v471_v54 = vadd.f32 %v1945_v22, %v470_v51 }
 0x146   : > { %v559_v53 = vmul.f32 %v532_v50, %v1701_v11 }
 0x147   : > { %1342 = vmatmul.msk.f32.gmra.mxu1 %vm416_vm2, %v1829_v58  ;;  %v486_v61 = vmul.f32 %v471_v54, %v1704_v12  ;;  %v1074_v54 = vld [vmem:[%s2320_s5 + $0x8] sm:$0xff] }
 0x148   : > { %v1983_v55 = vadd.f32 %v559_v53, %v485_v52  ;;  %1352 = vmatmul.msk.f32.gmra.mxu2 %vm416_vm2, %v1829_v58  ;;  %1115 = vmatpush.msra.mxu3 %v1074_v54  ;;  %v2077_v54 = vld [vmem:[%s2319_s4 + $0x3] ss:$0 sm:$0xff] }
 0x14b   : > { %v534_v57 = vpop.f32.mrf.mxu2  ;;  %v2035_v52 = vpop.f32.mrf.mxu3 }
 0x14c   : > { %v535_v59 = vadd.f32 %v1954_v30, %v534_v57  ;;  %v473_v60 = vpop.f32.mrf.mxu1 }
 0x14d   : > { %v474_v58 = vadd.f32 %v1945_v22, %v473_v60 }
 0x14e   : > { %v560_v62 = vmul.f32 %v535_v59, %v1714_v16 }
 0x14f   : > { %1343 = vmatmul.msk.f32.gmra.mxu1 %vm416_vm2, %v1845_v63  ;;  %v487_v26 = vmul.f32 %v474_v58, %v1707_v13 }
 0x150   : > { %v1995_v0 = vadd.f32 %v560_v62, %v486_v61  ;;  %1353 = vmatmul.msk.f32.gmra.mxu2 %vm416_vm2, %v1845_v63  ;;  %v458_v61 = vpop.f32.mrf.mxu0 }
 0x151   : > { %v459_v35 = vadd.f32 %v1945_v22, %v458_v61 }
 0x153   : > { %v537_v3 = vpop.f32.mrf.mxu2  ;;  %v2040_v57 = vpop.f32.mrf.mxu3 }
 0x154   : > { %v538_v6 = vadd.f32 %v1954_v30, %v537_v3  ;;  %v476_v10 = vpop.f32.mrf.mxu1 }
 0x155   : > { %v477_v34 = vadd.f32 %v1945_v22, %v476_v10 }
 0x156   : > { %v561_v31 = vmul.f32 %v538_v6, %v1723_v19  ;;  %v1073_v6 = vld [vmem:[%s2320_s5] sm:$0xff] }
 0x157   : > { %1344 = vmatmul.msk.f32.gmra.mxu1 %vm416_vm2, %v1855_v2  ;;  %v488_v39 = vmul.f32 %v477_v34, %v1726_v20  ;;  %1116 = vmatpush.msra.mxu3 %v1073_v6  ;;  %v622_v6 = vrot.slane %v1937_v15, 2 }
 0x158   : > { %v2010_v63 = vadd.f32 %v561_v31, %v487_v26  ;;  %1354 = vmatmul.msk.f32.gmra.mxu2 %vm416_vm2, %v1855_v2  ;;  %v522_v3 = vpop.f32.mrf.mxu0 }
 0x15b   : > { %v540_v36 = vpop.f32.mrf.mxu2  ;;  %v2048_v1 = vpop.f32.mrf.mxu3 }
 0x15c   : > { %v541_v37 = vadd.f32 %v1954_v30, %v540_v36  ;;  %v479_v38 = vpop.f32.mrf.mxu1 }
 0x15d   : > { %v480_v2 = vadd.f32 %v1945_v22, %v479_v38 }
 0x15e   : > { %v562_v41 = vmul.f32 %v541_v37, %v1736_v24 }
 0x15f   : > { %1345 = vmatmul.msk.f32.gmra.mxu1 %vm416_vm2, %v1865_v7  ;;  %v489_v49 = vmul.f32 %v480_v2, %v1729_v21 }
 0x160   : > { %v2022_v43 = vadd.f32 %v562_v41, %v488_v39  ;;  %1355 = vmatmul.msk.f32.gmra.mxu2 %vm416_vm2, %v1865_v7  ;;  %v596_v34 = vpop.f32.mrf.mxu0  ;;  %v278_v39 = vld [vmem:[%s1681_s7] sm:$0xff] }
 0x161   : > { %v549_v41 = vrot.slane %v278_v39, 1  ;;  %v482_v15 = vmul.f32 %v459_v35, %v278_v39  ;;  %v626_v35 = vrot.slane %v1684_v4, 2 }
 0x162   : > { %2342 = vst [vmem:[#allocation12_spill] sm:$0xff] %v2022_v43 }
 0x163   : > { %v543_v45 = vpop.f32.mrf.mxu2  ;;  %v2057_v31 = vpop.f32.mrf.mxu3 }
 0x164   : > { %v544_v46 = vadd.f32 %v1954_v30, %v543_v45  ;;  %v689_v48 = vpop.f32.mrf.mxu1  ;;  %2344 = vst [vmem:[#allocation14_spill] sm:$0xff] %v2057_v31 }
 0x165   : > { %v690_v43 = vadd.f32 %v2077_v54, %v689_v48 }
 0x166   : > { %v563_v50 = vmul.f32 %v544_v46, %v1745_v27  ;;  %v621_v46 = vrot.slane %v278_v39, 2 }
 0x167   : > { %v713_v28 = vmul.f32 %v690_v43, %v1684_v4  ;;  %v2113_v43 = vld [vmem:[%s2319_s4 + $0x6] ss:$0 sm:$0xff] }
 0x168   : > { %v2033_v51 = vadd.f32 %v563_v50, %v489_v49  ;;  %v888_v44 = vpop.f32.mrf.mxu0  ;;  %v523_v49 = vadd.f32 %v1954_v30, %v522_v3  ;;  %v2072_v50 = vld [vmem:[%s2319_s4 + $0x2] ss:$0 sm:$0xff]  ;;  %v2088_v3 = vld [vmem:[%s2319_s4 + $0x4] ss:$0 sm:$0xff]  ;;  %v623_v33 = vsel %vm620_vm3, %v621_v46, %v622_v6 }
 0x169   : > { %v597_v30 = vadd.f32 %v2072_v50, %v596_v34 }
 0x16a   : > { %2343 = vst [vmem:[#allocation13_spill] sm:$0xff] %v2033_v51  ;;  %v551_v51 = vsel %vm308_vm0, %v549_v41, %v550_v23  ;;  %v624_v41 = vrot.slane %v1934_v14, 2 }
 0x16b   : > { %v753_v7 = vpop.f32.mrf.mxu2  ;;  %v817_v38 = vpop.f32.mrf.mxu3  ;;  %v556_v31 = vmul.f32 %v551_v51, %v523_v49  ;;  %v649_v23 = vmul.f32 %v623_v33, %v597_v30  ;;  %v2102_v51 = vld [vmem:[%s2319_s4 + $0x5] ss:$0 sm:$0xff]  ;;  %v600_v33 = vadd.f32 %v2072_v50, %v1988_v56 }
 0x16c   : > { %v692_v53 = vpop.f32.mrf.mxu1  ;;  %v754_v22 = vadd.f32 %v2088_v3, %v753_v7  ;;  %v627_v7 = vrot.slane %v1687_v5, 2  ;;  %v625_v14 = vsel %vm620_vm3, %v622_v6, %v624_v41  ;;  %v818_v39 = vadd.f32 %v2102_v51, %v817_v38 }
 0x16d   : > { %v564_v34 = vadd.f32 %v556_v31, %v482_v15  ;;  %v693_v49 = vadd.f32 %v2077_v54, %v692_v53  ;;  %v650_v15 = vmul.f32 %v625_v14, %v600_v33  ;;  %v629_v41 = vrot.slane %v1692_v8, 2  ;;  %v2135_v33 = vld [vmem:[%s2319_s4 + $0x8] ss:$0 sm:$0xff] }
 0x16e   : > { %v777_v46 = vmul.f32 %v754_v22, %v1695_v9  ;;  %v2120_v9 = vld [vmem:[%s2319_s4 + $0x7] ss:$0 sm:$0xff] }
 0x16f   : > { %v657_v48 = vadd.f32 %v649_v23, %v564_v34  ;;  %v628_v23 = vsel %vm620_vm3, %v626_v35, %v627_v7  ;;  %v714_v53 = vmul.f32 %v693_v49, %v1687_v5  ;;  %v631_v5 = vrot.slane %v1704_v12, 2 }
 0x170   : > { %v891_v29 = vpop.f32.mrf.mxu0  ;;  %v848_v38 = vmul.f32 %v818_v39, %v628_v23  ;;  %v632_v35 = vrot.slane %v1707_v13, 2  ;;  %v630_v39 = vsel %vm620_vm3, %v627_v7, %v629_v41 }
 0x171   : > { %v721_v31 = vadd.f32 %v713_v28, %v657_v48  ;;  %v889_v28 = vadd.f32 %v2113_v43, %v888_v44  ;;  %v658_v48 = vadd.f32 %v650_v15, %v1963_v40  ;;  %v603_v44 = vadd.f32 %v2072_v50, %v2004_v18 }
 0x173   : > { %v756_v59 = vpop.f32.mrf.mxu2  ;;  %v820_v32 = vpop.f32.mrf.mxu3  ;;  %v785_v56 = vadd.f32 %v777_v46, %v721_v31  ;;  %v912_v40 = vmul.f32 %v889_v28, %v1704_v12  ;;  %v722_v14 = vadd.f32 %v714_v53, %v658_v48  ;;  %v892_v28 = vadd.f32 %v2113_v43, %v891_v29 }
 0x174   : > { %v2042_v60 = vpop.f32.mrf.mxu1  ;;  %v757_v6 = vadd.f32 %v2088_v3, %v756_v59  ;;  %v821_v8 = vadd.f32 %v2102_v51, %v820_v32  ;;  %v651_v32 = vmul.f32 %v628_v23, %v603_v44  ;;  %v606_v23 = vadd.f32 %v2072_v50, %v2018_v42 }
 0x175   : > { %v856_v46 = vadd.f32 %v848_v38, %v785_v56  ;;  %v633_v38 = vsel %vm620_vm3, %v631_v5, %v632_v35  ;;  %v634_v29 = vrot.slane %v1717_v17, 2 }
 0x176   : > { %v778_v59 = vmul.f32 %v757_v6, %v1701_v11  ;;  %v696_v11 = vadd.f32 %v2077_v54, %v2042_v60  ;;  %v849_v53 = vmul.f32 %v821_v8, %v630_v39 }
 0x177   : > { %v920_v6 = vadd.f32 %v912_v40, %v856_v46 }
 0x178   : > { %v786_v56 = vadd.f32 %v778_v59, %v722_v14  ;;  %v715_v60 = vmul.f32 %v696_v11, %v1704_v12  ;;  %v659_v59 = vadd.f32 %v651_v32, %v1973_v47  ;;  %v913_v12 = vmul.f32 %v892_v28, %v1707_v13 }
 0x17a   : > { %v723_v8 = vadd.f32 %v715_v60, %v659_v59 }
 0x17b   : > { %v2044_v62 = vpop.f32.mrf.mxu2  ;;  %v823_v22 = vpop.f32.mrf.mxu3 }
 0x17c   : > { %v2046_v58 = vpop.f32.mrf.mxu1  ;;  %v760_v18 = vadd.f32 %v2088_v3, %v2044_v62  ;;  %v857_v62 = vadd.f32 %v849_v53, %v786_v56  ;;  %v824_v44 = vadd.f32 %v2102_v51, %v823_v22 }
 0x17d   : > { %v699_v14 = vadd.f32 %v2077_v54, %v2046_v58 }
 0x17e   : > { %v779_v46 = vmul.f32 %v760_v18, %v1714_v16  ;;  %v635_v18 = vsel %vm620_vm3, %v632_v35, %v634_v29  ;;  %v637_v35 = vrot.slane %v1729_v21, 2 }
 0x17f   : > { %v716_v58 = vmul.f32 %v699_v14, %v1707_v13 }
 0x180   : > { %v787_v11 = vadd.f32 %v779_v46, %v723_v8 }
 0x183   : > { %v2053_v10 = vpop.f32.mrf.mxu2  ;;  %v826_v41 = vpop.f32.mrf.mxu3 }
 0x184   : > { %v2055_v26 = vpop.f32.mrf.mxu1  ;;  %v763_v42 = vadd.f32 %v2088_v3, %v2053_v10 }
 0x186   : > { %v780_v10 = vmul.f32 %v763_v42, %v1723_v19 }
 0x18b   : > { %v2059_v36 = vpop.f32.mrf.mxu2  ;;  %v829_v13 = vpop.f32.mrf.mxu3 }
 0x18c   : > { %v2061_v37 = vpop.f32.mrf.mxu1  ;;  %v766_v46 = vadd.f32 %v2088_v3, %v2059_v36 }
 0x18e   : > { %v781_v36 = vmul.f32 %v766_v46, %v1736_v24 }
 0x193   : > { %v2064_v2 = vpop.f32.mrf.mxu2 }
 0x194   : > { %v2066_v45 = vpop.f32.mrf.mxu1 }
 0x195   : > { %2345 = vst [vmem:[#allocation15_spill] sm:$0xff] %v2066_v45 }
 0x19b   : > { %v2092_v45 = vpop.f32.mrf.mxu2 }
 0x19c   : > { %v2095_v61 = vpop.f32.mrf.mxu1 }
 0x1a3   : > { %v2122_v4 = vpop.f32.mrf.mxu2 }
 0x1a4   : > { %2346 = vst [vmem:[#allocation16_spill] sm:$0xff] %v2122_v4  ;;  %v952_v30 = vpop.f32.mrf.mxu1  ;;  %v894_v4 = vpop.f32.mrf.mxu0 }
 0x1a5   : > { %v953_v34 = vadd.f32 %v2120_v9, %v952_v30  ;;  %v895_v56 = vadd.f32 %v2113_v43, %v894_v4  ;;  %v636_v4 = vrot.slane %v1726_v20, 2 }
 0x1a7   : > { %v986_v31 = vmul.f32 %v953_v34, %v1714_v16 }
 0x1a9   : > { %v994_v34 = vadd.f32 %v986_v31, %v920_v6  ;;  %v921_v31 = vadd.f32 %v913_v12, %v857_v62  ;;  %v850_v6 = vmul.f32 %v824_v44, %v633_v38  ;;  %v638_v12 = vsel %vm620_vm3, %v636_v4, %v637_v35 }
 0x1ab   : > { %v1026_v49 = vpop.f32.mrf.mxu2  ;;  %v858_v53 = vadd.f32 %v850_v6, %v787_v11 }
 0x1ac   : > { %v1027_v30 = vadd.f32 %v2135_v33, %v1026_v49  ;;  %v955_v15 = vpop.f32.mrf.mxu1  ;;  %v897_v5 = vpop.f32.mrf.mxu0  ;;  %v652_v49 = vmul.f32 %v630_v39, %v606_v23  ;;  %v609_v39 = vadd.f32 %v2072_v50, %v2035_v52 }
 0x1ad   : > { %v956_v7 = vadd.f32 %v2120_v9, %v955_v15  ;;  %v898_v44 = vadd.f32 %v2113_v43, %v897_v5  ;;  %v639_v5 = vrot.slane %v1739_v25, 2 }
 0x1ae   : > { %v1057_v48 = vmul.f32 %v1027_v30, %v633_v38  ;;  %v660_v28 = vadd.f32 %v652_v49, %v1983_v55  ;;  %v702_v55 = vadd.f32 %v2077_v54, %v2055_v26  ;;  %v653_v29 = vmul.f32 %v633_v38, %v609_v39 }
 0x1af   : > { %v987_v47 = vmul.f32 %v956_v7, %v1723_v19  ;;  %v612_v38 = vadd.f32 %v2072_v50, %v2040_v57  ;;  %v705_v49 = vadd.f32 %v2077_v54, %v2061_v37  ;;  %v769_v57 = vadd.f32 %v2088_v3, %v2064_v2 }
 0x1b0   : > { %v1065_v40 = vadd.f32 %v1057_v48, %v994_v34  ;;  %v827_v34 = vadd.f32 %v2102_v51, %v826_v41  ;;  %v914_v48 = vmul.f32 %v895_v56, %v1726_v20  ;;  %v724_v7 = vadd.f32 %v716_v58, %v660_v28 }
 0x1b1   : > { %v995_v30 = vadd.f32 %v987_v47, %v921_v31  ;;  %v717_v8 = vmul.f32 %v702_v55, %v1726_v20  ;;  %v661_v11 = vadd.f32 %v653_v29, %v1995_v0  ;;  %v832_v0 = vpop.f32.mrf.mxu3  ;;  %v640_v28 = vsel %vm620_vm3, %v637_v35, %v639_v5  ;;  %v2347_v35 = vld [vmem:[#allocation7_spill] sm:$0xff] }
 0x1b2   : > { %1356 = vmatmul.msk.f32.vlgmr.msra.gmra.mxu3 %vm345_vm1, %v1065_v40  ;;  %v788_v52 = vadd.f32 %v780_v10, %v724_v7  ;;  %v922_v40 = vadd.f32 %v914_v48, %v858_v53  ;;  %v851_v26 = vmul.f32 %v827_v34, %v635_v18  ;;  %v718_v10 = vmul.f32 %v705_v49, %v1729_v21 }
 0x1b3   : > { %v1029_v16 = vpop.f32.mrf.mxu2  ;;  %v725_v20 = vadd.f32 %v717_v8, %v661_v11  ;;  %v833_v7 = vadd.f32 %v2102_v51, %v832_v0  ;;  %v841_v55 = vrot.slane %v2347_v35, 2  ;;  %v2353_v0 = vld [vmem:[#allocation10_spill] sm:$0xff] }
 0x1b4   : > { %v1030_v17 = vadd.f32 %v2135_v33, %v1029_v16  ;;  %v958_v22 = vpop.f32.mrf.mxu1  ;;  %v900_v62 = vpop.f32.mrf.mxu0  ;;  %v859_v42 = vadd.f32 %v851_v26, %v788_v52  ;;  %v2349_v52 = vld [vmem:[#allocation15_spill] sm:$0xff] }
 0x1b5   : > { %v959_v32 = vadd.f32 %v2120_v9, %v958_v22  ;;  %v915_v22 = vmul.f32 %v898_v44, %v1729_v21  ;;  %v789_v6 = vadd.f32 %v781_v36, %v725_v20  ;;  %v708_v46 = vadd.f32 %v2077_v54, %v2349_v52  ;;  %v2352_v20 = vld [vmem:[#allocation14_spill] sm:$0xff] }
 0x1b6   : > { %v1058_v15 = vmul.f32 %v1030_v17, %v635_v18  ;;  %v830_v17 = vadd.f32 %v2102_v51, %v829_v13  ;;  %v782_v13 = vmul.f32 %v769_v57, %v1745_v27  ;;  %v618_v49 = vadd.f32 %v2072_v50, %v2352_v20  ;;  %v293_v57 = vld [vmem:[%s1681_s7 + $0x78] sm:$0xff] }
 0x1b7   : > { %v988_v59 = vmul.f32 %v959_v32, %v1736_v24  ;;  %v923_v58 = vadd.f32 %v915_v22, %v859_v42  ;;  %v901_v32 = vadd.f32 %v2113_v43, %v900_v62  ;;  %v719_v11 = vmul.f32 %v708_v46, %v2347_v35  ;;  %v2356_v46 = vld [vmem:[#allocation13_spill] sm:$0xff] }
 0x1b8   : > { %v1066_v60 = vadd.f32 %v1058_v15, %v995_v30  ;;  %v654_v15 = vmul.f32 %v635_v18, %v612_v38  ;;  %v852_v37 = vmul.f32 %v830_v17, %v638_v12  ;;  %v615_v18 = vadd.f32 %v2072_v50, %v2048_v1 }
 0x1b9   : > { %v996_v14 = vadd.f32 %v988_v59, %v922_v40  ;;  %v2348_v59 = vld [vmem:[#allocation8_spill] sm:$0xff]  ;;  %v916_v21 = vmul.f32 %v901_v32, %v2347_v35  ;;  %v772_v1 = vadd.f32 %v2088_v3, %v2092_v45 }
 0x1ba   : > { %1357 = vmatmul.msk.f32.gmra.mxu3 %vm345_vm1, %v1066_v60  ;;  %v662_v34 = vadd.f32 %v654_v15, %v2010_v63  ;;  %v860_v2 = vadd.f32 %v852_v37, %v789_v6  ;;  %v2350_v63 = vld [vmem:[#allocation9_spill] sm:$0xff]  ;;  %v655_v26 = vmul.f32 %v638_v12, %v615_v18  ;;  %v2351_v45 = vld [vmem:[#allocation12_spill] sm:$0xff]  ;;  %v2354_v15 = vld [vmem:[#allocation11_spill] sm:$0xff]  ;;  %v979_v37 = vrot.slane %v293_v57, 1 }
 0x1bb   : > { %v1032_v19 = vpop.f32.mrf.mxu2 }
 0x1bc   : > { %v1033_v41 = vadd.f32 %v2135_v33, %v1032_v19  ;;  %v961_v23 = vpop.f32.mrf.mxu1  ;;  %v903_v53 = vpop.f32.mrf.mxu0  ;;  %v842_v19 = vrot.slane %v2348_v59, 2  ;;  %v726_v62 = vadd.f32 %v718_v10, %v662_v34  ;;  %v663_v38 = vadd.f32 %v655_v26, %v2351_v45 }
 0x1bd   : > { %v962_v16 = vadd.f32 %v2120_v9, %v961_v23  ;;  %v924_v23 = vadd.f32 %v916_v21, %v860_v2  ;;  %v904_v8 = vadd.f32 %v2113_v43, %v903_v53  ;;  %v1050_v21 = vrot.slane %v293_v57, 2 }
 0x1be   : > { %v1059_v47 = vmul.f32 %v1033_v41, %v638_v12  ;;  %v790_v41 = vadd.f32 %v782_v13, %v726_v62  ;;  %v783_v12 = vmul.f32 %v772_v1, %v2350_v63  ;;  %v656_v13 = vmul.f32 %v640_v28, %v618_v49 }
 0x1bf   : > { %v989_v56 = vmul.f32 %v962_v16, %v1745_v27  ;;  %v843_v16 = vsel %vm620_vm3, %v841_v55, %v842_v19  ;;  %v917_v6 = vmul.f32 %v904_v8, %v2348_v59 }
 0x1c0   : > { %v1067_v31 = vadd.f32 %v1059_v47, %v996_v14  ;;  %v853_v14 = vmul.f32 %v833_v7, %v640_v28  ;;  %v835_v47 = vpop.f32.mrf.mxu3 }
 0x1c1   : > { %v997_v60 = vadd.f32 %v989_v56, %v923_v58  ;;  %v836_v56 = vadd.f32 %v2102_v51, %v835_v47  ;;  %v294_v58 = vld [vmem:[%s1681_s7 + $0x80] sm:$0xff] }
 0x1c2   : > { %1358 = vmatmul.msk.f32.gmra.mxu3 %vm345_vm1, %v1067_v31  ;;  %v861_v17 = vadd.f32 %v853_v14, %v790_v41  ;;  %v980_v53 = vrot.slane %v294_v58, 1  ;;  %v1051_v62 = vrot.slane %v294_v58, 2  ;;  %v295_v41 = vld [vmem:[%s1681_s7 + $0x88] sm:$0x3]  ;;  %s266_s7 = sand.u32 1, %s1528_s22  }
 0x1c3   : > { %v1035_v24 = vpop.f32.mrf.mxu2  ;;  %v982_v8 = vrot.slane %v295_v41, 1  ;;  %s1258_s18 = sshll.u32 %s266_s7, 6  ;;  %s1151_s24 = scalar_lea.sflag [#allocation3], %s266_s7 }
 0x1c4   : > { %v1036_v25 = vadd.f32 %v2135_v33, %v1035_v24  ;;  %v964_v30 = vpop.f32.mrf.mxu1  ;;  %v906_v5 = vpop.f32.mrf.mxu0  ;;  %v844_v24 = vrot.slane %v2353_v0, 2  ;;  %v981_v52 = vsel %vm308_vm0, %v979_v37, %v980_v53  ;;  %v1052_v26 = vsel %vm620_vm3, %v1050_v21, %v1051_v62  ;;  %s268_s19 = scalar_lea.vmem [#allocation2], %s1258_s18 }
 0x1c5   : > { %v965_v4 = vadd.f32 %v2120_v9, %v964_v30  ;;  %v711_v30 = vadd.f32 %v2077_v54, %v2095_v61  ;;  %v854_v54 = vmul.f32 %v843_v16, %v836_v56  ;;  %s1165_s14 = sshll.u32 %s268_s19, 4  ;;  %s1166_s14 = int_to_ptr.vmem [resolvable:$true] %s1165_s14 }
 0x1c6   : > { %v1060_v39 = vmul.f32 %v1036_v25, %v640_v28  ;;  %v727_v25 = vadd.f32 %v719_v11, %v663_v38  ;;  %v845_v61 = vsel %vm620_vm3, %v842_v19, %v844_v24 }
 0x1c7   : > { %v990_v40 = vmul.f32 %v965_v4, %v2350_v63  ;;  %v925_v4 = vadd.f32 %v917_v6, %v861_v17  ;;  %v720_v18 = vmul.f32 %v711_v30, %v2348_v59  ;;  %v664_v63 = vadd.f32 %v656_v13, %v2356_v46 }
 0x1c8   : > { %v1068_v48 = vadd.f32 %v1060_v39, %v997_v60  ;;  %v791_v50 = vadd.f32 %v783_v12, %v727_v25  ;;  %v2355_v60 = vld [vmem:[#allocation16_spill] sm:$0xff] }
 0x1c9   : > { %v998_v42 = vadd.f32 %v990_v40, %v924_v23  ;;  %v775_v39 = vadd.f32 %v2088_v3, %v2355_v60  ;;  %v838_v3 = vpop.f32.mrf.mxu3  ;;  %v728_v23 = vadd.f32 %v720_v18, %v664_v63 }
 0x1ca   : > { %1359 = vmatmul.msk.f32.gmra.mxu3 %vm345_vm1, %v1068_v48  ;;  %v907_v48 = vadd.f32 %v2113_v43, %v906_v5  ;;  %v862_v28 = vadd.f32 %v854_v54, %v791_v50  ;;  %v839_v59 = vadd.f32 %v2102_v51, %v838_v3  ;;  %v983_v51 = vsel %vm308_vm0, %v980_v53, %v982_v8 }
 0x1cb   : > { %v1038_v27 = vpop.f32.mrf.mxu2  ;;  %v784_v40 = vmul.f32 %v775_v39, %v2354_v15  ;;  %v1053_v5 = vrot.slane %v295_v41, 2 }
 0x1cc   : > { %v1039_v29 = vadd.f32 %v2135_v33, %v1038_v27  ;;  %v967_v44 = vpop.f32.mrf.mxu1  ;;  %v918_v1 = vmul.f32 %v907_v48, %v293_v57  ;;  %v909_v19 = vpop.f32.mrf.mxu0 }
 0x1cd   : > { %v968_v31 = vadd.f32 %v2120_v9, %v967_v44  ;;  %v792_v14 = vadd.f32 %v784_v40, %v728_v23  ;;  %v1054_v56 = vsel %vm620_vm3, %v1051_v62, %v1053_v5 }
 0x1ce   : > { %v1061_v36 = vmul.f32 %v1039_v29, %v843_v16  ;;  %v926_v47 = vadd.f32 %v918_v1, %v862_v28 }
 0x1cf   : > { %v991_v32 = vmul.f32 %v968_v31, %v2354_v15 }
 0x1d0   : > { %v1069_v22 = vadd.f32 %v1061_v36, %v998_v42  ;;  %v910_v42 = vadd.f32 %v2113_v43, %v909_v19  ;;  %v855_v36 = vmul.f32 %v845_v61, %v839_v59 }
 0x1d1   : > { %v999_v7 = vadd.f32 %v991_v32, %v925_v4 }
 0x1d2   : > { %1360 = vmatmul.msk.f32.gmra.mxu3 %vm345_vm1, %v1069_v22  ;;  %v863_v17 = vadd.f32 %v855_v36, %v792_v14  ;;  %v919_v22 = vmul.f32 %v910_v42, %v294_v58 }
 0x1d3   : > { %v1041_v10 = vpop.f32.mrf.mxu2 }
 0x1d4   : > { %v1042_v34 = vadd.f32 %v2135_v33, %v1041_v10  ;;  %v970_v2 = vpop.f32.mrf.mxu1  ;;  %v927_v0 = vadd.f32 %v919_v22, %v863_v17 }
 0x1d5   : > { %v971_v55 = vadd.f32 %v2120_v9, %v970_v2 }
 0x1d6   : > { %v1062_v35 = vmul.f32 %v1042_v34, %v845_v61 }
 0x1d7   : > { %v992_v29 = vmul.f32 %v981_v52, %v971_v55 }
 0x1d8   : > { %v1070_v27 = vadd.f32 %v1062_v35, %v999_v7 }
 0x1d9   : > { %v1000_v31 = vadd.f32 %v992_v29, %v926_v47 }
 0x1da   : > { %1361 = vmatmul.msk.f32.gmra.mxu3 %vm345_vm1, %v1070_v27 }
 0x1db   : > { %v1044_v44 = vpop.f32.mrf.mxu2 }
 0x1dc   : > { %v1045_v16 = vadd.f32 %v2135_v33, %v1044_v44  ;;  %v973_v11 = vpop.f32.mrf.mxu1 }
 0x1dd   : > { %v974_v38 = vadd.f32 %v2120_v9, %v973_v11 }
 0x1de   : > { %v1063_v45 = vmul.f32 %v1052_v26, %v1045_v16 }
 0x1df   : > { %v993_v20 = vmul.f32 %v983_v51, %v974_v38 }
 0x1e0   : > { %v1071_v12 = vadd.f32 %v1063_v45, %v1000_v31 }
 0x1e1   : > { %v1001_v24 = vadd.f32 %v993_v20, %v927_v0 }
 0x1e2   : > { %1362 = vmatmul.msk.f32.gmra.mxu3 %vm345_vm1, %v1071_v12 }
 0x1e3   : > { %v1047_v49 = vpop.f32.mrf.mxu2 }
 0x1e4   : > { %v1048_v43 = vadd.f32 %v2135_v33, %v1047_v49 }
 0x1e6   : > { %v1064_v6 = vmul.f32 %v1054_v56, %v1048_v43 }
 0x1e8   : > { %v1072_v9 = vadd.f32 %v1064_v6, %v1001_v24 }
 0x1ea   : > { %1363 = vmatmul.msk.f32.gmra.mxu3 %vm345_vm1, %v1072_v9 }
 0x235   : > { %v1118_v57 = vpop.f32.mrf.mxu3 }
 0x236   : > { %1142 = vst.msk [vmem:[%s268_s19] sm:$0xff] %vm345_vm1, %v1118_v57 }
 0x23d   : > { %v1121_v58 = vpop.f32.mrf.mxu3 }
 0x23e   : > { %1143 = vst.msk [vmem:[%s268_s19 + $0x8] sm:$0xff] %vm345_vm1, %v1121_v58 }
 0x245   : > { %v1124_v25 = vpop.f32.mrf.mxu3 }
 0x246   : > { %1144 = vst.msk [vmem:[%s268_s19 + $0x10] sm:$0xff] %vm345_vm1, %v1124_v25 }
 0x24d   : > { %v1127_v33 = vpop.f32.mrf.mxu3 }
 0x24e   : > { %1145 = vst.msk [vmem:[%s268_s19 + $0x18] sm:$0xff] %vm345_vm1, %v1127_v33 }
 0x255   : > { %v1130_v30 = vpop.f32.mrf.mxu3 }
 0x256   : > { %1146 = vst.msk [vmem:[%s268_s19 + $0x20] sm:$0xff] %vm345_vm1, %v1130_v30 }
 0x25d   : > { %v1133_v15 = vpop.f32.mrf.mxu3 }
 0x25e   : > { %1147 = vst.msk [vmem:[%s268_s19 + $0x28] sm:$0xff] %vm345_vm1, %v1133_v15 }
 0x265   : > { %v1136_v32 = vpop.f32.mrf.mxu3 }
 0x266   : > { %1148 = vst.msk [vmem:[%s268_s19 + $0x30] sm:$0xff] %vm345_vm1, %v1136_v32 }
 0x26d   : > { %v1139_v37 = vpop.f32.mrf.mxu3 }
 0x26e   : > { %1149 = vst.msk [vmem:[%s268_s19 + $0x38] sm:$0xff] %vm345_vm1, %v1139_v37 }
 0x26f   : > { %1485 = shalt.err (!%p1482_p7)
}
 0x270   : > { %s1554_s7 = smov 128   ;;  %s1555_s19 = smov 8  }
 0x271   : > { %1375 = dma.vmem_to_hbm [thread:$0]  (%p1642_p3), %s1166_s14, 1024, %s1168_s16, %s1151_s24, %s1554_s7, %s1554_s7, %s1555_s19  }
 0x272 PF: > { %p1381_p9 = scmp.ge.s32.totalorder %s1552_s28, 2  ;;  %s1182_s9 = sand.u32 1, %s1524_s21  }
 0x273   : > { %s1183_s12 = scalar_lea.sflag [#allocation3], %s1182_s9 }
 0x274   : > { %p1378_p10 = pnand %p1381_p9, %p1651_p8 }
 0x276   : > { %p1379_p11 = pneg %p1378_p10 }
 0x278   : > { %1519 = dma.done.wait (%p1379_p11), %s1183_s12, 1024  }
 0x279   : > { %1521 = vsyncadd (%p1379_p11), %s1183_s12, 4294966272  ;;  %s19_s28 = sadd.s32 1, %s1552_s28   ;;  %s2357_s10 = sld [smem:[#allocation5_spill]] }
 0x27a   : > { %p16_p12 = scmp.ge.s32.totalorder %s19_s28, 10   ;;  %s2358_s13 = sld [smem:[#allocation6_spill]] }
 0x27b   : > { %s2359_s21 = smov %s1528_s22  ;;  %s2360_s22 = smov %s1532_s23 }
 0x27c   : > { %s2361_s23 = smov %s1660_s15  ;;  %s2362_s24 = smov %s1544_s26 }
 0x27d   : > { %s2363_s25 = smov %s1548_s27  ;;  %18 = sbr.rel (!%p16_p12) target bundleno = 5 (0x5), region = 95 }
 0x27f   : > { %s2364_s26 = smov %s2357_s10 }
 0x280   : > { %s2365_s27 = smov %s2358_s13 }
 0x282   :  { %1189 = vsyncpa [#allocation3], 1 }
 0x283   :  { %1191 = vsyncpa [#allocation3 + $0x1], 1 }

</bundles_post_ra>
